<compile_context>
chip_gen: v5e
topology: v5e:2x2
jax: 0.10.0
libtpu: 0.0.40
codegen_flags: <defaults>
</compile_context>

<pallas_src>
import functools

import jax
import jax.numpy as jnp
from jax.experimental import pallas as pl
from jax.experimental.pallas import tpu as pltpu


def _round_up(v, m):
    return ((v + m - 1) // m) * m


def _vmem_limit_bytes():
    phys = None
    try:
        phys = getattr(pltpu.get_tpu_info(), "vmem_capacity_bytes", None)
    except Exception:
        phys = None
    if not phys:
        phys = 64 * 1024 * 1024          # conservative (v7x per-TC VMEM)
    return int(min(int(phys * 0.8), 112 * 1024 * 1024))


def _pick_tile_n(n):
    """Row tile: 8-row aligned; for large N use 128-row multiples (MXU M fill)
    capped at 512, sized so the row grid has >= 2 steps (v7x 2-TC sharding)."""
    if n <= 128:
        return max(8, _round_up(n, 8))
    return max(128, min(512, _round_up(pl.cdiv(n, 2), 128)))


def _lstm_step_kernel(x_ref, h_ref, c_ref, wih_ref, whh_ref, b_ref,
                      h_out_ref, c_out_ref, *, hdim):
    """One LSTM cell step for a tile of rows.

    x_ref:     (tile_n, ip_dim)  f32
    h_ref:     (tile_n, H)       f32
    c_ref:     (tile_n, H)       f32
    wih_ref:   (ip_dim, 4H)      bf16   (W_ih^T, gate order i,f,g,o)
    whh_ref:   (H, 4H)           bf16   (W_hh^T)
    b_ref:     (1, 4H)           f32    (b_ih + b_hh)
    h_out_ref: (tile_n, H)       f32
    c_out_ref: (tile_n, H)       f32
    """
    x = x_ref[...].astype(jnp.bfloat16)
    h = h_ref[...].astype(jnp.bfloat16)

    # Two MXU matmuls with f32 accumulation (MXU has large slack at these K
    # depths; doing both here avoids any wrapper-side concat/cast HBM pass).
    gates = jnp.dot(x, wih_ref[...], preferred_element_type=jnp.float32)
    gates = gates + jnp.dot(h, whh_ref[...],
                            preferred_element_type=jnp.float32)
    gates = gates + b_ref[...]

    if 4 * hdim <= 128:
        # All four gates fit in one 128-lane vreg: activate the packed slab
        # with a single sigmoid + single tanh EUP pass and select the tanh
        # lanes (the g gate) with a lane-iota mask.
        lane = jax.lax.broadcasted_iota(jnp.int32, gates.shape, 1)
        g_lane = (lane >= 2 * hdim) & (lane < 3 * hdim)
        act = jnp.where(g_lane, jnp.tanh(gates), jax.nn.sigmoid(gates))
        i_g = act[:, 0 * hdim:1 * hdim]
        f_g = act[:, 1 * hdim:2 * hdim]
        g_g = act[:, 2 * hdim:3 * hdim]
        o_g = act[:, 3 * hdim:4 * hdim]
    else:
        # H >= 128: every gate slice is whole 128-lane vregs.
        i_g = jax.nn.sigmoid(gates[:, 0 * hdim:1 * hdim])
        f_g = jax.nn.sigmoid(gates[:, 1 * hdim:2 * hdim])
        g_g = jnp.tanh(gates[:, 2 * hdim:3 * hdim])
        o_g = jax.nn.sigmoid(gates[:, 3 * hdim:4 * hdim])

    # Element-wise gate math stays f32 (v5e has no bf16 VPU/EUP).
    c_new = f_g * c_ref[...] + i_g * g_g
    h_new = o_g * jnp.tanh(c_new)

    h_out_ref[...] = h_new.astype(h_out_ref.dtype)
    c_out_ref[...] = c_new.astype(c_out_ref.dtype)


def lstm_step_pallas(x, h, c, w_ih_t, w_hh_t, bias, *, tile_n=None):
    """x: (N, ip) f32, h/c: (N, H) f32 -> (h_new, c_new), each (N, H) f32."""
    n, ip_dim = x.shape
    hdim = h.shape[1]
    if tile_n is None:
        tile_n = _pick_tile_n(n)
    grid = (pl.cdiv(n, tile_n),)

    # Weight / bias blocks are grid-invariant (constant index maps).  For
    # large weights drop to single buffering so VMEM is not double-allocated
    # for them (matters on v7x's 64 MiB VMEM when H is ~1k).
    resident_kwargs = {}
    weight_bytes = (w_ih_t.size + w_hh_t.size) * w_ih_t.dtype.itemsize
    if weight_bytes > (4 << 20) and hasattr(pl, "Buffered"):
        resident_kwargs = dict(pipeline_mode=pl.Buffered(1))

    kernel = functools.partial(_lstm_step_kernel, hdim=hdim)
    h_out, c_out = pl.pallas_call(
        kernel,
        out_shape=(jax.ShapeDtypeStruct((n, hdim), jnp.float32),
                   jax.ShapeDtypeStruct((n, hdim), jnp.float32)),
        grid_spec=pltpu.PrefetchScalarGridSpec(
            num_scalar_prefetch=0,
            grid=grid,
            in_specs=[
                pl.BlockSpec((tile_n, ip_dim), lambda i: (i, 0)),      # x
                pl.BlockSpec((tile_n, hdim), lambda i: (i, 0)),        # h
                pl.BlockSpec((tile_n, hdim), lambda i: (i, 0)),        # c
                pl.BlockSpec((ip_dim, 4 * hdim), lambda i: (0, 0),
                             **resident_kwargs),                       # W_ih^T
                pl.BlockSpec((hdim, 4 * hdim), lambda i: (0, 0),
                             **resident_kwargs),                       # W_hh^T
                pl.BlockSpec((1, 4 * hdim), lambda i: (0, 0)),         # bias
            ],
            out_specs=[
                pl.BlockSpec((tile_n, hdim), lambda i: (i, 0)),        # h_new
                pl.BlockSpec((tile_n, hdim), lambda i: (i, 0)),        # c_new
            ],
        ),
        compiler_params=pltpu.CompilerParams(
            dimension_semantics=("parallel",),
            vmem_limit_bytes=_vmem_limit_bytes()),
    )(x, h, c, w_ih_t, w_hh_t, bias)
    return h_out, c_out


class LSTMPallas:
    """Mirrors the PyTorch `lstm` module forward semantics (one LSTM step)."""

    def __init__(self, ip_dim, hidden_dim, key):
        self.ip_dim = ip_dim
        self.hidden_dim = hidden_dim
        H = hidden_dim
        k = float(1.0 / (H ** 0.5))
        k1, k2, k3, k4 = jax.random.split(key, 4)
        # PyTorch layout: weight_ih_l0 (4H, ip), weight_hh_l0 (4H, H),
        # biases (4H,), gate order [i, f, g, o], init U(-1/sqrt(H), 1/sqrt(H)).
        w_ih = jax.random.uniform(k1, (4 * H, ip_dim), jnp.float32, -k, k)
        w_hh = jax.random.uniform(k2, (4 * H, H), jnp.float32, -k, k)
        b_ih = jax.random.uniform(k3, (4 * H,), jnp.float32, -k, k)
        b_hh = jax.random.uniform(k4, (4 * H,), jnp.float32, -k, k)

        # Transposed bf16 weights for the MXU; no per-gate padding.
        self.w_ih_t = jnp.transpose(w_ih).astype(jnp.bfloat16)   # (ip, 4H)
        self.w_hh_t = jnp.transpose(w_hh).astype(jnp.bfloat16)   # (H, 4H)
        self.bias = (b_ih + b_hh).reshape(1, 4 * H).astype(jnp.float32)

    def __call__(self, x, h_t, c_t):
        """
        x:   (batch_size, num_pedestrians, ip_dim)
        h_t: viewable as (1, total_peds, hidden)
        c_t: (1, total_peds, hidden)
        Returns (h_out, c_out):
          h_out: (batch_size, num_pedestrians, hidden)
          c_out: (1, total_peds, hidden)
        """
        batch_size, num_peds = x.shape[0], x.shape[1]
        N = batch_size * num_peds
        H = self.hidden_dim

        # Reshapes of contiguous arrays only -- no extra HBM passes.
        x_flat = x.reshape(N, self.ip_dim).astype(jnp.float32)
        h_flat = h_t.reshape(N, H).astype(jnp.float32)
        c_flat = c_t.reshape(N, H).astype(jnp.float32)

        h_new, c_new = lstm_step_pallas(x_flat, h_flat, c_flat,
                                        self.w_ih_t, self.w_hh_t, self.bias)

        return (h_new.reshape(batch_size, num_peds, H),
                c_new.reshape(1, N, H))


def _reference(x, h_t, c_t, model):
    """Plain-JAX reference using the same bf16 MXU operands as the kernel."""
    B, P = x.shape[0], x.shape[1]
    H = model.hidden_dim
    N = B * P
    xf = x.reshape(N, model.ip_dim).astype(jnp.float32)
    hf = h_t.reshape(N, H).astype(jnp.float32)
    cf = c_t.reshape(N, H).astype(jnp.float32)
    gates = (jnp.dot(xf.astype(jnp.bfloat16), model.w_ih_t,
                     preferred_element_type=jnp.float32)
             + jnp.dot(hf.astype(jnp.bfloat16), model.w_hh_t,
                       preferred_element_type=jnp.float32)
             + model.bias)
    i = jax.nn.sigmoid(gates[:, 0 * H:1 * H])
    f = jax.nn.sigmoid(gates[:, 1 * H:2 * H])
    g = jnp.tanh(gates[:, 2 * H:3 * H])
    o = jax.nn.sigmoid(gates[:, 3 * H:4 * H])
    c_new = f * cf + i * g
    h_new = o * jnp.tanh(c_new)
    return h_new.reshape(B, P, H), c_new.reshape(1, N, H)


if __name__ == "__main__":
    key = jax.random.PRNGKey(0)
    k_param, k_x, k_h, k_c = jax.random.split(key, 4)

    batch_size, num_peds = 2, 4
    ip_dim, hidden_dim = 16, 32
    total = batch_size * num_peds

    model = LSTMPallas(ip_dim, hidden_dim, k_param)

    x = jax.random.normal(k_x, (batch_size, num_peds, ip_dim), jnp.float32)
    h_t = jax.random.normal(k_h, (1, total, hidden_dim), jnp.float32)
    c_t = jax.random.normal(k_c, (1, total, hidden_dim), jnp.float32)

    h_out, c_out = model(x, h_t, c_t)
    h_out = jax.block_until_ready(h_out)
    c_out = jax.block_until_ready(c_out)

    # Sanity check against a plain-JAX reference (same bf16 MXU operands).
    h_ref, c_ref = _reference(x, h_t, c_t, model)
    assert h_out.shape == (batch_size, num_peds, hidden_dim)
    assert c_out.shape == (1, total, hidden_dim)
    assert jnp.allclose(h_out, h_ref, atol=2e-3, rtol=2e-3), "h mismatch"
    assert jnp.allclose(c_out, c_ref, atol=2e-3, rtol=2e-3), "c mismatch"

    print("KERNEL_OK")
</pallas_src>

<mosaic_0001>
module attributes {stable_mosaic.version = 11 : i64} {
  func.func @_lstm_step_kernel(%arg0: i32, %arg1: memref<8x16xf32, #tpu.memory_space<vmem>>, %arg2: memref<8x32xf32, #tpu.memory_space<vmem>>, %arg3: memref<8x32xf32, #tpu.memory_space<vmem>>, %arg4: memref<16x128xbf16, #tpu.memory_space<vmem>>, %arg5: memref<32x128xbf16, #tpu.memory_space<vmem>>, %arg6: memref<1x128xf32, #tpu.memory_space<vmem>>, %arg7: memref<8x32xf32, #tpu.memory_space<vmem>>, %arg8: memref<8x32xf32, #tpu.memory_space<vmem>>) attributes {dimension_semantics = [#tpu.dimension_semantics<parallel>], iteration_bounds = array<i64: 1>, scalar_prefetch = 0 : i64, scratch_operands = 0 : i64, tpu.core_type = #tpu.core_type<tc>, window_params = [{transform_indices = @transform_0, window_bounds = array<i64: 8, 16>}, {transform_indices = @transform_1, window_bounds = array<i64: 8, 32>}, {transform_indices = @transform_2, window_bounds = array<i64: 8, 32>}, {pipeline_mode = #tpu.pipeline_mode<synchronous>, transform_indices = @transform_3, window_bounds = array<i64: 16, 128>}, {pipeline_mode = #tpu.pipeline_mode<synchronous>, transform_indices = @transform_4, window_bounds = array<i64: 32, 128>}, {pipeline_mode = #tpu.pipeline_mode<synchronous>, transform_indices = @transform_5, window_bounds = array<i64: 1, 128>}, {transform_indices = @transform_6, window_bounds = array<i64: 8, 32>}, {transform_indices = @transform_7, window_bounds = array<i64: 8, 32>}]} {
    %c0 = arith.constant 0 : index
    %c0_0 = arith.constant 0 : index
    %0 = vector.load %arg1[%c0, %c0_0] : memref<8x16xf32, #tpu.memory_space<vmem>>, vector<8x16xf32>
    %1 = arith.truncf %0 : vector<8x16xf32> to vector<8x16xbf16>
    %c0_1 = arith.constant 0 : index
    %c0_2 = arith.constant 0 : index
    %2 = vector.load %arg2[%c0_1, %c0_2] : memref<8x32xf32, #tpu.memory_space<vmem>>, vector<8x32xf32>
    %3 = arith.truncf %2 : vector<8x32xf32> to vector<8x32xbf16>
    %c0_3 = arith.constant 0 : index
    %c0_4 = arith.constant 0 : index
    %4 = vector.load %arg4[%c0_3, %c0_4] : memref<16x128xbf16, #tpu.memory_space<vmem>>, vector<16x128xbf16>
    %cst = arith.constant dense<0.000000e+00> : vector<8x128xf32>
    %5 = tpu.matmul %1, %4, %cst {dimension_numbers = #tpu.dot_dimension_numbers<[1], [0], [0], [1], [0, 0, 1, 1], [], []>} : vector<8x16xbf16>, vector<16x128xbf16>, vector<8x128xf32> -> vector<8x128xf32>
    %c0_5 = arith.constant 0 : index
    %c0_6 = arith.constant 0 : index
    %6 = vector.load %arg5[%c0_5, %c0_6] : memref<32x128xbf16, #tpu.memory_space<vmem>>, vector<32x128xbf16>
    %cst_7 = arith.constant dense<0.000000e+00> : vector<8x128xf32>
    %7 = tpu.matmul %3, %6, %cst_7 {dimension_numbers = #tpu.dot_dimension_numbers<[1], [0], [0], [1], [0, 0, 1, 1], [], []>} : vector<8x32xbf16>, vector<32x128xbf16>, vector<8x128xf32> -> vector<8x128xf32>
    %8 = arith.addf %5, %7 : vector<8x128xf32>
    %c0_8 = arith.constant 0 : index
    %c0_9 = arith.constant 0 : index
    %9 = vector.load %arg6[%c0_8, %c0_9] : memref<1x128xf32, #tpu.memory_space<vmem>>, vector<1x128xf32>
    %10 = vector.broadcast %9 : vector<1x128xf32> to vector<8x128xf32>
    %11 = arith.addf %8, %10 : vector<8x128xf32>
    %12 = tpu.iota {dimensions = array<i32: 1>} : vector<8x128xi32>
    %c64_i32 = arith.constant 64 : i32
    %13 = vector.broadcast %c64_i32 : i32 to vector<8x128xi32>
    %14 = arith.cmpi sge, %12, %13 : vector<8x128xi32>
    %c96_i32 = arith.constant 96 : i32
    %15 = vector.broadcast %c96_i32 : i32 to vector<8x128xi32>
    %16 = arith.cmpi slt, %12, %15 : vector<8x128xi32>
    %17 = arith.andi %14, %16 : vector<8x128xi1>
    %18 = math.tanh %11 : vector<8x128xf32>
    %19 = arith.negf %11 : vector<8x128xf32>
    %20 = math.exp %19 : vector<8x128xf32>
    %cst_10 = arith.constant 1.000000e+00 : f32
    %21 = vector.broadcast %cst_10 : f32 to vector<8x128xf32>
    %22 = arith.addf %21, %20 : vector<8x128xf32>
    %23 = arith.divf %21, %22 : vector<8x128xf32>
    %24 = arith.select %17, %18, %23 : vector<8x128xi1>, vector<8x128xf32>
    %25 = vector.extract_strided_slice %24 {offsets = [0, 0], sizes = [8, 32], strides = [1, 1]} : vector<8x128xf32> to vector<8x32xf32>
    %26 = vector.extract_strided_slice %24 {offsets = [0, 32], sizes = [8, 32], strides = [1, 1]} : vector<8x128xf32> to vector<8x32xf32>
    %27 = vector.extract_strided_slice %24 {offsets = [0, 64], sizes = [8, 32], strides = [1, 1]} : vector<8x128xf32> to vector<8x32xf32>
    %28 = vector.extract_strided_slice %24 {offsets = [0, 96], sizes = [8, 32], strides = [1, 1]} : vector<8x128xf32> to vector<8x32xf32>
    %c0_11 = arith.constant 0 : index
    %c0_12 = arith.constant 0 : index
    %29 = vector.load %arg3[%c0_11, %c0_12] : memref<8x32xf32, #tpu.memory_space<vmem>>, vector<8x32xf32>
    %30 = arith.mulf %26, %29 : vector<8x32xf32>
    %31 = arith.mulf %25, %27 : vector<8x32xf32>
    %32 = arith.addf %30, %31 : vector<8x32xf32>
    %33 = math.tanh %32 : vector<8x32xf32>
    %34 = arith.mulf %28, %33 : vector<8x32xf32>
    %c0_13 = arith.constant 0 : index
    %c0_14 = arith.constant 0 : index
    %35 = vector.load %arg7[%c0_13, %c0_14] : memref<8x32xf32, #tpu.memory_space<vmem>>, vector<8x32xf32>
    tpu.vector_store %arg7[%c0_13, %c0_14], %34 {strides = array<i32>} : memref<8x32xf32, #tpu.memory_space<vmem>>, vector<8x32xf32>,
    %c0_15 = arith.constant 0 : index
    %c0_16 = arith.constant 0 : index
    %36 = vector.load %arg8[%c0_15, %c0_16] : memref<8x32xf32, #tpu.memory_space<vmem>>, vector<8x32xf32>
    tpu.vector_store %arg8[%c0_15, %c0_16], %32 {strides = array<i32>} : memref<8x32xf32, #tpu.memory_space<vmem>>, vector<8x32xf32>,
    return
  }
  func.func @transform_0(%arg0: i32) -> (i32, i32) {
    %c0_i32 = arith.constant 0 : i32
    %c0_i32_0 = arith.constant 0 : i32
    return %arg0, %c0_i32 : i32, i32
  }
  func.func @transform_1(%arg0: i32) -> (i32, i32) {
    %c0_i32 = arith.constant 0 : i32
    %c0_i32_0 = arith.constant 0 : i32
    return %arg0, %c0_i32 : i32, i32
  }
  func.func @transform_2(%arg0: i32) -> (i32, i32) {
    %c0_i32 = arith.constant 0 : i32
    %c0_i32_0 = arith.constant 0 : i32
    return %arg0, %c0_i32 : i32, i32
  }
  func.func @transform_3(%arg0: i32) -> (i32, i32) {
    %c0_i32 = arith.constant 0 : i32
    %c0_i32_0 = arith.constant 0 : i32
    %c0_i32_1 = arith.constant 0 : i32
    return %c0_i32, %c0_i32_0 : i32, i32
  }
  func.func @transform_4(%arg0: i32) -> (i32, i32) {
    %c0_i32 = arith.constant 0 : i32
    %c0_i32_0 = arith.constant 0 : i32
    %c0_i32_1 = arith.constant 0 : i32
    return %c0_i32, %c0_i32_0 : i32, i32
  }
  func.func @transform_5(%arg0: i32) -> (i32, i32) {
    %c0_i32 = arith.constant 0 : i32
    %c0_i32_0 = arith.constant 0 : i32
    %c0_i32_1 = arith.constant 0 : i32
    return %c0_i32, %c0_i32_0 : i32, i32
  }
  func.func @transform_6(%arg0: i32) -> (i32, i32) {
    %c0_i32 = arith.constant 0 : i32
    %c0_i32_0 = arith.constant 0 : i32
    return %arg0, %c0_i32 : i32, i32
  }
  func.func @transform_7(%arg0: i32) -> (i32, i32) {
    %c0_i32 = arith.constant 0 : i32
    %c0_i32_0 = arith.constant 0 : i32
    return %arg0, %c0_i32 : i32, i32
  }
}

</mosaic_0001>

<bundles_post_ra>
// kernel: tpu_custom_call.1
= control target key start
LH: loop header
LB: loop body
LE: loop exit
PB: predicated region body
PF: predicated region fallthrough
CT: control target
= control target key end

     0   :  { %13 = vsyncpa [#allocation3], 0  ;;  %s560_s0 = inlined_call_operand.hbm [shape: f32[8,16], index: 0, kind: input, shape index: {}]   ;;  %s561_s1 = inlined_call_operand.hbm [shape: f32[8,32], index: 1, kind: input, shape index: {}]   ;;  %s562_s2 = inlined_call_operand.hbm [shape: f32[8,32], index: 2, kind: input, shape index: {}]   ;;  %s563_s3 = inlined_call_operand.hbm [shape: bf16[16,128], index: 3, kind: input, shape index: {}]   ;;  %s564_s4 = inlined_call_operand.hbm [shape: bf16[32,128], index: 4, kind: input, shape index: {}]   ;;  %s565_s5 = inlined_call_operand.vmem [shape: f32[1,128], index: 5, kind: input, shape index: {}]   ;;  %s566_s6 = inlined_call_operand.hbm [shape: f32[8,32], index: 6, kind: output, shape index: {0}]   ;;  %s567_s7 = inlined_call_operand.hbm [shape: f32[8,32], index: 7, kind: output, shape index: {1}]  }
   0x1   :  { %14 = vsyncpa [#allocation6], 0 }
   0x2   :  { %15 = vsyncpa [#allocation9], 0 }
   0x3   :  { %16 = vsyncpa [#allocation4], 0  ;;  %s34_s26 = sshll.u32 %s561_s1, 4  ;;  %s35_s26 = int_to_ptr.hbm [resolvable:$true] %s34_s26 }
   0x4   :  { %17 = vsyncpa [#allocation13], 0  ;;  %s476_s27 = smov [#allocation5]   ;;  %s55_s8 = sshll.u32 %s563_s3, 4  ;;  %s56_s8 = int_to_ptr.hbm [resolvable:$true] %s55_s8 }
   0x5   :  { %s36_s28 = sshll.u32 %s476_s27, 4  ;;  %s477_s9 = smov [#allocation8]   ;;  %s37_s28 = int_to_ptr.vmem [resolvable:$true] %s36_s28 }
   0x6   :  { %39 = dma.hbm_to_vmem [thread:$0]  %s35_s26, 128, %s37_s28, [#allocation6]  }
   0x7   :  { %s57_s10 = sshll.u32 %s477_s9, 4  ;;  %s478_s11 = smov 64   ;;  %s58_s10 = int_to_ptr.vmem [resolvable:$true] %s57_s10 }
   0x8   :  { %s479_s12 = smov 4   ;;  %s23_s14 = sshll.u32 %s560_s0, 4  ;;  %s24_s14 = int_to_ptr.hbm [resolvable:$true] %s23_s14 }
   0x9   :  { %63 = dma.hbm_to_vmem [thread:$0]  %s56_s8, 128, %s58_s10, [#allocation9], %s478_s11, %s478_s11, %s479_s12  }
   0xa   :  { %s480_s15 = smov [#allocation2]   ;;  %s45_s18 = sshll.u32 %s562_s2, 4  ;;  %s46_s18 = int_to_ptr.hbm [resolvable:$true] %s45_s18 }
   0xb   :  { %s25_s16 = sshll.u32 %s480_s15, 4  ;;  %s481_s19 = smov [#allocation7]   ;;  %s26_s16 = int_to_ptr.vmem [resolvable:$true] %s25_s16 }
   0xc   :  { %28 = dma.hbm_to_vmem [thread:$0]  %s24_s14, 128, %s26_s16, [#allocation3]  }
   0xd   :  { %s47_s20 = sshll.u32 %s481_s19, 4  ;;  %s68_s23 = sshll.u32 %s564_s4, 4  ;;  %s48_s20 = int_to_ptr.vmem [resolvable:$true] %s47_s20  ;;  %s69_s23 = int_to_ptr.hbm [resolvable:$true] %s68_s23 }
   0xe   :  { %50 = dma.hbm_to_vmem [thread:$0]  %s46_s18, 128, %s48_s20, [#allocation6]  }
   0xf   :  { %s482_s0 = smov [#allocation10]  }
  0x10   :  { %s70_s24 = sshll.u32 %s482_s0, 4  ;;  %s71_s24 = int_to_ptr.vmem [resolvable:$true] %s70_s24 }
  0x11   :  { %76 = dma.hbm_to_vmem [thread:$0]  %s69_s23, 256, %s71_s24, [#allocation9], %s478_s11, %s478_s11, %s479_s12  }
  0x12   :  { %466 = dma.done.wait [#allocation3], 128  }
  0x13   :  { %467 = vsyncadd [#allocation3], 4294967168 }
  0x14   :  { %468 = dma.done.wait [#allocation6], 256  }
  0x15   :  { %469 = vsyncadd [#allocation6], 4294967040 }
  0x16   :  { %470 = dma.done.wait [#allocation9], 384  }
  0x17   :  { %471 = vsyncadd [#allocation9], 4294966912  ;;  %v277_v0 = vld [vmem:[#allocation10 + $0x8] sm:$0xff]  ;;  %v275_v1 = vld [vmem:[#allocation8] sm:$0xff]  ;;  %vm145_vm0 = vcmask 130048   ;;  %vm122_vm1 = vcmask 261120   ;;  %v167_v17 = vlaneseq }
  0x18   :  { %v100_v2 = vld [vmem:[#allocation2] sm:$0xff]  ;;  %132 = vmatpush.bf16.msra.mxu0 %v277_v0  ;;  %156 = vmatpush.bf16.msra.mxu1 %v275_v1  ;;  %v102_v5 = vld [vmem:[#allocation5] sm:$0xff]  ;;  %v193_v31 = vld [vmem:[#allocation7] sm:$0xff]  ;;  %s484_s25 = smov 96   ;;  %s485_s26 = smov [#allocation11]  }
  0x19   :  { %v101_v3 = vpack.c.bf16 %v100_v2, %v100_v2  ;;  %v276_v4 = vld [vmem:[#allocation10] sm:$0xff]  ;;  %v103_v6 = vpack.c.bf16 %v102_v5, %v102_v5  ;;  %v168_v19 = vand.u32 127, %v167_v17  ;;  %s230_s27 = sshll.u32 %s485_s26, 4  ;;  %s232_s30 = sshll.u32 %s566_s6, 4  ;;  %s231_s27 = int_to_ptr.vmem [resolvable:$true] %s230_s27  ;;  %s233_s30 = int_to_ptr.hbm [resolvable:$true] %s232_s30 }
  0x1a   :  { %v289_v8 = vld [vmem:[%s565_s5] ss:$0 sm:$0xff]  ;;  %s483_s5 = smov 32   ;;  %s486_s8 = smov [#allocation12]  }
  0x1b   :  { %273 = vmatmul.msk.bf16.vlgmr.msra.gmra.mxu1 %vm145_vm0, %v101_v3  ;;  %vm169_vm2 = vcmp.ge.s32.totalorder %v168_v19, 64  ;;  %vm170_vm3 = vcmp.lt.s32.totalorder %v168_v19, 96  ;;  %s241_s9 = sshll.u32 %s486_s8, 4  ;;  %s243_s12 = sshll.u32 %s567_s7, 4  ;;  %s242_s9 = int_to_ptr.vmem [resolvable:$true] %s241_s9  ;;  %s244_s12 = int_to_ptr.hbm [resolvable:$true] %s243_s12 }
  0x1c   :  { %133 = vmatpush.bf16.msra.mxu0 %v276_v4  ;;  %vm171_vm5 = vmand %vm169_vm2, %vm170_vm3 }
  0x1f   :  { %268 = vmatmul.msk.bf16.vlgmr.msra.gmra.mxu0 %vm122_vm1, %v103_v6 }
  0x98   :  { %v158_v7 = vpop.f32.mrf.mxu1 }
  0x9c   :  { %v135_v9 = vpop.f32.mrf.mxu0 }
  0x9d   :  { %v159_v10 = vadd.f32 %v158_v7, %v135_v9 }
  0x9f   :  { %v166_v11 = vadd.f32 %v289_v8, %v159_v10 }
  0xa0   :  { %v160_v12 = vpop.f32.mrf.mxu1 }
  0xa1   :  { %v274_v13 = vmul.f32 -1.442695, %v166_v11 }
  0xa3   :  { %290 = vpow2.f32 %v274_v13 }
  0xa4   :  { %v137_v14 = vpop.f32.mrf.mxu0 }
  0xa9   :  { %v291_v15 = vpop.eup %290 }
  0xaa   :  { %v176_v16 = vadd.f32 1.0, %v291_v15 }
  0xac   :  { %292 = vrcp.f32 %v176_v16  ;;  %v188_v22 = vand.u32 2147483648, %v176_v16  ;;  %v186_v24 = vand.u32 2147483647, %v176_v16  ;;  %vm182_vm6 = vweird.f32 %v176_v16 }
  0xad   :  { %294 = vtanh.f32 %v166_v11 }
  0xae   :  { %v189_v26 = vor.u32 1.1754944e-38, %v188_v22  ;;  %vm187_vm8 = vcmp.eq.f32.partialorder %v186_v24, 8.507059e+37 }
  0xb2   :  { %v293_v18 = vpop.eup %292 }
  0xb3   :  { %v178_v20 = vmul.f32 %v293_v18, %v176_v16  ;;  %vm183_vm4 = vweird.f32 %v293_v18  ;;  %v295_v28 = vpop.eup %294 }
  0xb4   :  { %vm184_vm7 = vmor %vm182_vm6, %vm183_vm4 }
  0xb5   :  { %v179_v21 = vsub.f32 1.0, %v178_v20 }
  0xb7   :  { %v180_v23 = vmul.f32 %v293_v18, %v179_v21 }
  0xb9   :  { %v181_v25 = vadd.f32 %v293_v18, %v180_v23 }
  0xbb   :  { %v185_v27 = vsel %vm184_vm7, %v293_v18, %v181_v25 }
  0xbc   :  { %v190_v29 = vsel %vm187_vm8, %v189_v26, %v185_v27 }
  0xbd   :  { %v192_v30 = vsel %vm171_vm5, %v295_v28, %v190_v29 }
  0xbe   :  { %200 = vrot.lane.b32.xlu0 %v192_v30, %s478_s11 }
  0xc6   :  { %195 = vrot.lane.b32.xlu0 %v193_v31, %s483_s5 }
 0x130   :  { %v201_v32 = vpop.permute.xlu0 %200 }
 0x131   :  { %v203_v33 = vmul.f32 %v201_v32, %v192_v30 }
 0x133   :  { %205 = vrot.lane.b32.xlu1 %v203_v33, %s483_s5 }
 0x138   :  { %v196_v34 = vpop.permute.xlu0 %195 }
 0x139   :  { %v198_v35 = vmul.f32 %v196_v34, %v192_v30 }
 0x1a5   :  { %v206_v36 = vpop.permute.xlu1 %205 }
 0x1a6   :  { %v208_v37 = vadd.f32 %v206_v36, %v198_v35 }
 0x1a8   :  { %296 = vtanh.f32 %v208_v37 }
 0x1ae   :  { %v297_v38 = vpop.eup %296 }
 0x1af   :  { %211 = vrot.lane.b32.xlu1 %v297_v38, %s478_s11 }
 0x221   :  { %v212_v39 = vpop.permute.xlu1 %211 }
 0x222   :  { %v214_v40 = vmul.f32 %v212_v39, %v192_v30 }
 0x224   :  { %216 = vrot.lane.b32.xlu2 %v214_v40, %s483_s5 }
 0x22c   :  { %221 = vrot.lane.b32.xlu2 %v208_v37, %s484_s25 }
 0x27e   :  { %v217_v41 = vpop.permute.xlu2 %216 }
 0x27f   :  { %219 = vst.msk [vmem:[#allocation11] sm:$0xff] %vm122_vm1, %v217_v41 }
 0x280   :  { %235 = dma.vmem_to_hbm [thread:$0]  %s231_s27, 128, %s233_s30, [#allocation4]  }
 0x286   :  { %v222_v42 = vpop.permute.xlu2 %221 }
 0x287   :  { %224 = vst.msk [vmem:[#allocation12] sm:$0xff] %vm122_vm1, %v222_v42 }
 0x288   :  { %246 = dma.vmem_to_hbm [thread:$0]  %s242_s9, 128, %s244_s12, [#allocation13]  }
 0x289   :  { %472 = dma.done.wait [#allocation4], 128  }
 0x28a   :  { %473 = vsyncadd [#allocation4], 4294967168 }
 0x28b   :  { %474 = dma.done.wait [#allocation13], 128  }
 0x28c   :  { %475 = vsyncadd [#allocation13], 4294967168 }
 0x28d   :  { %255 = vsyncpa [#allocation3], 1 }
 0x28e   :  { %256 = vsyncpa [#allocation6], 1 }
 0x28f   :  { %257 = vsyncpa [#allocation9], 1 }
 0x290   :  { %258 = vsyncpa [#allocation4], 1 }
 0x291   :  { %259 = vsyncpa [#allocation13], 1 }

</bundles_post_ra>
